<compile_context>
chip_gen: v7x
topology: tpu7x:2x2x1
jax: 0.10.0
libtpu: 0.0.40
codegen_flags: <defaults>
</compile_context>

<pallas_src>
import jax
import jax.numpy as jnp
from jax.experimental import pallas as pl
from jax.experimental.pallas import tpu as pltpu

LN_EPS = 1e-5

# FC-block order in the stacked weights:
#   0 = fc_v, 1 = fc_t, 2 = fc_mix, 3 = fc_mix_v, 4 = fc_mix_t


def _round_up(x, m):
    return ((x + m - 1) // m) * m


# --------------------------- VMEM / tile sizing -------------------------------

def _vmem_limit_bytes():
    """Per-generation scoped-VMEM budget (review item: don't hardcode 32 MiB)."""
    cap = None
    try:
        cap = int(pltpu.get_tpu_info().vmem_capacity_bytes)
    except Exception:
        cap = None
    if not cap or cap <= 0:
        cap = 64 * 1024 * 1024          # conservative fallback (v7x-sized)
    # ~75% of physical, capped: v5e/v6e (128 MiB) -> 96 MiB, v7x (64 MiB) -> 48 MiB.
    return min(cap * 3 // 4, 100 * 1024 * 1024)


def _pick_bc_tile(BC, sub, bc_max):
    """Pick a sublane-aligned B*C block.  Prefer >=2 blocks so the 'parallel'
    bc axis can shard phase 1 across the two v7x TensorCores."""
    if BC <= sub:
        return BC
    if BC % sub != 0:
        # no clean sublane-multiple divisor
        return BC if BC <= bc_max else bc_max          # cdiv grid, clipped last block
    best_split, best_any = 0, 0
    cand = sub
    top = min(bc_max, BC)
    while cand <= top:
        if BC % cand == 0:
            best_any = cand
            if BC // cand >= 2:
                best_split = cand
        cand += sub
    if best_split:
        return best_split
    if BC <= bc_max:
        return BC
    return best_any if best_any else BC


def _pick_hw_tile(HW, bc_tile, itemsize, block_bytes):
    """Lane tile sized by bytes.  Prefer a 128-multiple divisor of HW (no
    masking); otherwise fall back to a 128-multiple tile + in-kernel mask."""
    max_lanes = (block_bytes // max(1, bc_tile * itemsize)) // 128 * 128
    max_lanes = max(128, max_lanes)
    if HW <= max_lanes:
        return HW, False                                # single full-width tile
    t = max_lanes
    while t >= 128:
        if HW % t == 0:
            return t, False
        t -= 128
    return max_lanes, True                              # ragged: cdiv grid + mask


def _fused_fits(B, C, HW, itemsize, limit):
    """Can rgb/thermal/out (+ f32 temps + weights) stay resident in VMEM?"""
    c_pad = _round_up(C, 8 if itemsize >= 4 else 16)
    hw_pad = _round_up(HW, 128)
    tile = B * c_pad * hw_pad
    weights = 5 * C * C * 4 + 15 * _round_up(C, 128) * 4
    need = 3 * tile * itemsize + 2 * tile * 4 + weights + (1 << 20)
    return need <= limit // 2


# --------------------------- coefficient math (shared) ------------------------

def _coef_math(rgb_pool, th_pool, w, b, g, be):
    """fc chains + softmaxes on pooled (B, C) activations (all f32).
    Returns (coef_rgb, coef_th) with coef = modality_softmax_weight + channel_softmax."""

    def fc_block(x, i):
        y = jnp.dot(x, w[i], preferred_element_type=jnp.float32) + b[i]
        mu = jnp.mean(y, axis=-1, keepdims=True)
        var = jnp.mean(jnp.square(y - mu), axis=-1, keepdims=True)
        y = (y - mu) * jax.lax.rsqrt(var + LN_EPS) * g[i] + be[i]
        return jnp.maximum(y, 0.0)

    def softmax_last(y):
        m = jnp.max(y, axis=-1, keepdims=True)
        e = jnp.exp(y - m)
        return e / jnp.sum(e, axis=-1, keepdims=True)

    s_rgb = softmax_last(fc_block(rgb_pool, 0))      # softmax(fc_v(pool(rgb)))
    s_th = softmax_last(fc_block(th_pool, 1))        # softmax(fc_t(pool(thermal)))

    fc = fc_block(rgb_pool + th_pool, 2)             # fc_mix(pool(rgb + thermal))
    v = fc_block(fc, 3)                              # fc_mix_v
    t = fc_block(fc, 4)                              # fc_mix_t

    # softmax over the 2-modality axis
    m = jnp.maximum(v, t)
    ev = jnp.exp(v - m)
    et = jnp.exp(t - m)
    inv = 1.0 / (ev + et)
    return ev * inv + s_rgb, et * inv + s_th


# --------------------------- phase 1: streaming channel sums ------------------

def _make_pool_kernel(HW, hw_tile, ragged):
    n_chunks = hw_tile // 128
    whole_chunks = (hw_tile % 128 == 0) and n_chunks >= 1

    def kernel(rgb_ref, th_ref, rsum_ref, tsum_ref, racc, tacc):
        k = pl.program_id(1)

        @pl.when(k == 0)
        def _init():
            racc[...] = jnp.zeros_like(racc)
            tacc[...] = jnp.zeros_like(tacc)

        x = rgb_ref[...]
        y = th_ref[...]
        if ragged:
            # last spatial tile overhangs HW: mask the invalid lanes to zero
            lane = jax.lax.broadcasted_iota(jnp.int32, x.shape, 1) + k * hw_tile
            valid = lane < HW
            x = jnp.where(valid, x, jnp.zeros_like(x))
            y = jnp.where(valid, y, jnp.zeros_like(y))

        if whole_chunks:
            # Pure-VPU lane-chunk accumulation per step (f32 accumulation even
            # for bf16 inputs); the single cross-lane (XLU) reduce is deferred
            # to the last step so it never gates the streamed hot loop.
            for c in range(n_chunks):
                sl = slice(c * 128, (c + 1) * 128)
                racc[...] += x[:, sl].astype(jnp.float32)
                tacc[...] += y[:, sl].astype(jnp.float32)

            @pl.when(k == pl.num_programs(1) - 1)
            def _finalize():
                rsum_ref[...] = jnp.sum(racc[...], axis=-1, keepdims=True)
                tsum_ref[...] = jnp.sum(tacc[...], axis=-1, keepdims=True)
        else:
            # hw_tile == HW (single spatial tile, possibly < 128 lanes)
            rsum_ref[...] = jnp.sum(x.astype(jnp.float32), axis=-1, keepdims=True)
            tsum_ref[...] = jnp.sum(y.astype(jnp.float32), axis=-1, keepdims=True)

    return kernel


# --------------------------- coefficient kernel (tiny, single block) ----------

def _make_coef_kernel(inv_hw):
    def kernel(rsum_ref, tsum_ref, w_ref, b_ref, g_ref, be_ref, cr_ref, ct_ref):
        rgb_pool = rsum_ref[...] * inv_hw            # (B, C) == AdaptiveAvgPool2d((1,1))
        th_pool = tsum_ref[...] * inv_hw
        cr, ct = _coef_math(rgb_pool, th_pool,
                            w_ref[...], b_ref[...], g_ref[...], be_ref[...])
        cr_ref[...] = cr
        ct_ref[...] = ct
    return kernel


# --------------------------- phase 2: streaming fuse --------------------------

def _fuse_kernel(cr_ref, ct_ref, rgb_ref, th_ref, out_ref):
    # Math in the input dtype: bf16-native on v6e/v7x for bf16 inputs, f32 for
    # f32 inputs (v5e always sees f32 or compiler-handled conversions).
    dt = out_ref.dtype
    cr = cr_ref[...].astype(dt)                      # (bc_tile, 1)
    ct = ct_ref[...].astype(dt)
    out_ref[...] = rgb_ref[...] * cr + th_ref[...] * ct


# --------------------------- fused single-kernel path (small maps) ------------

def _make_fused_kernel(inv_hw):
    def kernel(rgb_ref, th_ref, w_ref, b_ref, g_ref, be_ref, out_ref):
        rgb = rgb_ref[...]                           # (B, C, HW), fully resident
        th = th_ref[...]
        rgb_pool = jnp.sum(rgb.astype(jnp.float32), axis=-1) * inv_hw
        th_pool = jnp.sum(th.astype(jnp.float32), axis=-1) * inv_hw
        cr, ct = _coef_math(rgb_pool, th_pool,
                            w_ref[...], b_ref[...], g_ref[...], be_ref[...])
        dt = out_ref.dtype
        out_ref[...] = rgb * cr.astype(dt)[:, :, None] + th * ct.astype(dt)[:, :, None]
    return kernel


# --------------------------- wrapper ------------------------------------------

def modality_mix_pallas(rgb, thermal, params, *, fuse_phases=None, block_bytes=None):
    """rgb, thermal: (B, C, H, W) NCHW (PyTorch convention)."""
    assert rgb.shape == thermal.shape and rgb.dtype == thermal.dtype
    B, C, H, W = rgb.shape
    HW = H * W
    BC = B * C
    dtype = rgb.dtype
    itemsize = jnp.dtype(dtype).itemsize

    w_t = params["w_t"]        # (5, C, C)  pre-transposed linear weights
    b = params["b"]            # (5, 1, C)
    g = params["gamma"]        # (5, 1, C)
    be = params["beta"]        # (5, 1, C)

    limit = _vmem_limit_bytes()
    if block_bytes is None:
        # byte-targeted streamed block: (2 in + 1 out) x 2 buffers within budget
        block_bytes = max(1 << 20, min(8 << 20, limit // 12))
    inv_hw = 1.0 / float(HW)

    if fuse_phases is None:
        fuse_phases = _fused_fits(B, C, HW, itemsize, limit)

    # ---- fully-resident fused path: 3 HBM passes instead of 5 ---------------
    if fuse_phases:
        out = pl.pallas_call(
            _make_fused_kernel(inv_hw),
            out_shape=jax.ShapeDtypeStruct((B, C, HW), dtype),
            compiler_params=pltpu.CompilerParams(vmem_limit_bytes=limit),
            cost_estimate=pl.CostEstimate(
                flops=5 * BC * HW + 12 * B * C * C,
                transcendentals=6 * B * C,
                bytes_accessed=3 * BC * HW * itemsize + 5 * C * C * 4),
        )(rgb.reshape(B, C, HW), thermal.reshape(B, C, HW), w_t, b, g, be)
        return out.reshape(B, C, H, W)

    # ---- two-phase streaming path (large feature maps) ----------------------
    sub = 8 if itemsize >= 4 else (16 if itemsize == 2 else 32)
    bc_max = max(sub, (block_bytes // (128 * itemsize)) // sub * sub)
    bc_tile = _pick_bc_tile(BC, sub, bc_max)
    n_bc = pl.cdiv(BC, bc_tile)
    hw_tile, ragged = _pick_hw_tile(HW, bc_tile, itemsize, block_bytes)
    n_hw = pl.cdiv(HW, hw_tile)

    # contiguity-preserving (free) reshapes -- no jnp.pad anywhere
    rgb_flat = rgb.reshape(BC, HW)
    th_flat = thermal.reshape(BC, HW)

    # phase 1: pooled channel sums (no weights in VMEM; bc axis megacore-parallel)
    rsum, tsum = pl.pallas_call(
        _make_pool_kernel(HW, hw_tile, ragged),
        out_shape=(jax.ShapeDtypeStruct((BC, 1), jnp.float32),
                   jax.ShapeDtypeStruct((BC, 1), jnp.float32)),
        grid=(n_bc, n_hw),
        in_specs=[pl.BlockSpec((bc_tile, hw_tile), lambda i, k: (i, k)),
                  pl.BlockSpec((bc_tile, hw_tile), lambda i, k: (i, k))],
        out_specs=[pl.BlockSpec((bc_tile, 1), lambda i, k: (i, 0)),
                   pl.BlockSpec((bc_tile, 1), lambda i, k: (i, 0))],
        scratch_shapes=[pltpu.VMEM((bc_tile, 128), jnp.float32),
                        pltpu.VMEM((bc_tile, 128), jnp.float32)],
        compiler_params=pltpu.CompilerParams(
            dimension_semantics=("parallel", "arbitrary"),
            vmem_limit_bytes=limit),
        cost_estimate=pl.CostEstimate(
            flops=2 * BC * HW, transcendentals=0,
            bytes_accessed=2 * BC * HW * itemsize + 2 * BC * 4),
    )(rgb_flat, th_flat)

    # tiny coefficient chain: single-block kernel, weights enter VMEM once
    # TODO(synk): for very large C (5*C*C*4 > VMEM budget) this single-block
    # coefficient kernel would need a tiled matmul; not needed for typical C.
    coef_rgb, coef_th = pl.pallas_call(
        _make_coef_kernel(inv_hw),
        out_shape=(jax.ShapeDtypeStruct((B, C), jnp.float32),
                   jax.ShapeDtypeStruct((B, C), jnp.float32)),
        compiler_params=pltpu.CompilerParams(vmem_limit_bytes=limit),
    )(rsum.reshape(B, C), tsum.reshape(B, C), w_t, b, g, be)

    # phase 2: streaming fuse (lane-dense stores, both axes parallel)
    # Optional knobs deliberately not enabled here:
    #   - pipeline_mode=pl.Buffered(3) on rgb/th if a profile shows exposed DMA
    #   - input_output_aliases={2: 0} if the caller allows clobbering rgb
    out_flat = pl.pallas_call(
        _fuse_kernel,
        out_shape=jax.ShapeDtypeStruct((BC, HW), dtype),
        grid=(n_bc, n_hw),
        in_specs=[pl.BlockSpec((bc_tile, 1), lambda i, k: (i, 0)),
                  pl.BlockSpec((bc_tile, 1), lambda i, k: (i, 0)),
                  pl.BlockSpec((bc_tile, hw_tile), lambda i, k: (i, k)),
                  pl.BlockSpec((bc_tile, hw_tile), lambda i, k: (i, k))],
        out_specs=pl.BlockSpec((bc_tile, hw_tile), lambda i, k: (i, k)),
        compiler_params=pltpu.CompilerParams(
            dimension_semantics=("parallel", "parallel"),
            vmem_limit_bytes=limit),
        cost_estimate=pl.CostEstimate(
            flops=3 * BC * HW, transcendentals=0,
            bytes_accessed=3 * BC * HW * itemsize + 2 * BC * 4),
    )(coef_rgb.reshape(BC, 1), coef_th.reshape(BC, 1), rgb_flat, th_flat)

    return out_flat.reshape(B, C, H, W)


# ---------------- pure-JAX reference (mirrors the PyTorch forward) ------------

def _fc_block_ref(x, w_t, b, g, be):
    y = x @ w_t + b
    mu = y.mean(-1, keepdims=True)
    var = ((y - mu) ** 2).mean(-1, keepdims=True)
    y = (y - mu) / jnp.sqrt(var + LN_EPS) * g + be
    return jnp.maximum(y, 0.0)


def modality_mix_ref(rgb, thermal, params):
    w_t, b, g, be = params["w_t"], params["b"], params["gamma"], params["beta"]
    pool = lambda x: x.mean(axis=(2, 3))                        # (B, C)

    rgb_v = _fc_block_ref(pool(rgb), w_t[0], b[0], g[0], be[0])
    rgb_v = jax.nn.softmax(rgb_v, axis=1)[..., None, None] * rgb

    th_t = _fc_block_ref(pool(thermal), w_t[1], b[1], g[1], be[1])
    th_t = jax.nn.softmax(th_t, axis=1)[..., None, None] * thermal

    fc = _fc_block_ref(pool(rgb + thermal), w_t[2], b[2], g[2], be[2])
    v = _fc_block_ref(fc, w_t[3], b[3], g[3], be[3])
    t = _fc_block_ref(fc, w_t[4], b[4], g[4], be[4])
    combined = jnp.stack([v, t], axis=1)                        # (B, 2, C)
    weights = jax.nn.softmax(combined, axis=1)
    v_w = weights[:, 0, :][..., None, None]
    t_w = weights[:, 1, :][..., None, None]

    return rgb * v_w + rgb_v + thermal * t_w + th_t


# ---------------- deterministic parameter init --------------------------------

def init_params(key, in_dims):
    # PyTorch nn.Linear default: U(-1/sqrt(fan_in), 1/sqrt(fan_in)); LN: gamma=1, beta=0
    kw, kb = jax.random.split(key)
    bound = 1.0 / float(jnp.sqrt(in_dims))
    w = jax.random.uniform(kw, (5, in_dims, in_dims), jnp.float32, -bound, bound)
    bias = jax.random.uniform(kb, (5, 1, in_dims), jnp.float32, -bound, bound)
    w_t = jnp.transpose(w, (0, 2, 1))                  # pre-transpose: x @ W.T == x @ w_t
    gamma = jnp.ones((5, 1, in_dims), jnp.float32)
    beta = jnp.zeros((5, 1, in_dims), jnp.float32)
    return {"w_t": w_t, "b": bias, "gamma": gamma, "beta": beta}


if __name__ == "__main__":
    key = jax.random.PRNGKey(0)
    k1, k2, k3 = jax.random.split(key, 3)

    def run_case(B, C, H, W, k, *, fuse_phases, block_bytes, tag):
        ka, kb, kc = jax.random.split(k, 3)
        rgb = jax.random.normal(ka, (B, C, H, W), jnp.float32)
        thermal = jax.random.normal(kb, (B, C, H, W), jnp.float32)
        params = init_params(kc, C)
        out = modality_mix_pallas(rgb, thermal, params,
                                  fuse_phases=fuse_phases, block_bytes=block_bytes)
        out = jax.block_until_ready(out)
        ref = modality_mix_ref(rgb, thermal, params)
        assert out.shape == (B, C, H, W)
        err = float(jnp.max(jnp.abs(out - ref)))
        assert jnp.allclose(out, ref, atol=1e-4, rtol=1e-4), f"{tag}: max err {err}"

    # 1) small map -> auto-selected fully-resident fused kernel (3 HBM passes)
    run_case(2, 4, 16, 16, k1, fuse_phases=None, block_bytes=None, tag="fused")
    # 2) same shape forced through the two-phase streaming path
    run_case(2, 4, 16, 16, k1, fuse_phases=False, block_bytes=None, tag="two-phase")
    # 3) multi-tile two-phase path (2 bc blocks x 2 spatial tiles, pipelined pool)
    run_case(2, 16, 32, 32, k2, fuse_phases=False, block_bytes=32 * 1024, tag="tiled")
    # 4) ragged HW (400, not a multiple of 128): masked pooling + clipped last fuse tile
    run_case(2, 8, 20, 20, k3, fuse_phases=False, block_bytes=4 * 1024, tag="ragged")

    print("KERNEL_OK")
</pallas_src>

<mosaic_0001>
module attributes {stable_mosaic.version = 11 : i64} {
  func.func @kernel(%arg0: memref<2x4x256xf32, #tpu.memory_space<vmem>>, %arg1: memref<2x4x256xf32, #tpu.memory_space<vmem>>, %arg2: memref<5x4x4xf32, #tpu.memory_space<vmem>>, %arg3: memref<5x1x4xf32, #tpu.memory_space<vmem>>, %arg4: memref<5x1x4xf32, #tpu.memory_space<vmem>>, %arg5: memref<5x1x4xf32, #tpu.memory_space<vmem>>, %arg6: memref<2x4x256xf32, #tpu.memory_space<vmem>>) attributes {dimension_semantics = [], scalar_prefetch = 0 : i64, scratch_operands = 0 : i64, tpu.core_type = #tpu.core_type<tc>} {
    %c0 = arith.constant 0 : index
    %c0_0 = arith.constant 0 : index
    %c0_1 = arith.constant 0 : index
    %0 = vector.load %arg0[%c0, %c0_0, %c0_1] : memref<2x4x256xf32, #tpu.memory_space<vmem>>, vector<2x4x256xf32>
    %c0_2 = arith.constant 0 : index
    %c0_3 = arith.constant 0 : index
    %c0_4 = arith.constant 0 : index
    %1 = vector.load %arg1[%c0_2, %c0_3, %c0_4] : memref<2x4x256xf32, #tpu.memory_space<vmem>>, vector<2x4x256xf32>
    %cst = arith.constant dense<0.000000e+00> : vector<2x4xf32>
    %2 = vector.multi_reduction <add>, %0, %cst [2] : vector<2x4x256xf32> to vector<2x4xf32>
    %cst_5 = arith.constant 3.906250e-03 : f32
    %3 = vector.broadcast %cst_5 : f32 to vector<2x4xf32>
    %4 = arith.mulf %2, %3 : vector<2x4xf32>
    %cst_6 = arith.constant dense<0.000000e+00> : vector<2x4xf32>
    %5 = vector.multi_reduction <add>, %1, %cst_6 [2] : vector<2x4x256xf32> to vector<2x4xf32>
    %cst_7 = arith.constant 3.906250e-03 : f32
    %6 = vector.broadcast %cst_7 : f32 to vector<2x4xf32>
    %7 = arith.mulf %5, %6 : vector<2x4xf32>
    %c0_8 = arith.constant 0 : index
    %c0_9 = arith.constant 0 : index
    %c0_10 = arith.constant 0 : index
    %8 = vector.load %arg2[%c0_8, %c0_9, %c0_10] : memref<5x4x4xf32, #tpu.memory_space<vmem>>, vector<5x4x4xf32>
    %c0_11 = arith.constant 0 : index
    %c0_12 = arith.constant 0 : index
    %c0_13 = arith.constant 0 : index
    %9 = vector.load %arg3[%c0_11, %c0_12, %c0_13] : memref<5x1x4xf32, #tpu.memory_space<vmem>>, vector<5x1x4xf32>
    %c0_14 = arith.constant 0 : index
    %c0_15 = arith.constant 0 : index
    %c0_16 = arith.constant 0 : index
    %10 = vector.load %arg4[%c0_14, %c0_15, %c0_16] : memref<5x1x4xf32, #tpu.memory_space<vmem>>, vector<5x1x4xf32>
    %c0_17 = arith.constant 0 : index
    %c0_18 = arith.constant 0 : index
    %c0_19 = arith.constant 0 : index
    %11 = vector.load %arg5[%c0_17, %c0_18, %c0_19] : memref<5x1x4xf32, #tpu.memory_space<vmem>>, vector<5x1x4xf32>
    %12 = vector.extract_strided_slice %8 {offsets = [0, 0, 0], sizes = [1, 4, 4], strides = [1, 1, 1]} : vector<5x4x4xf32> to vector<1x4x4xf32>
    %13 = vector.shape_cast %12 : vector<1x4x4xf32> to vector<4x4xf32>
    %cst_20 = arith.constant dense<0.000000e+00> : vector<2x4xf32>
    %14 = tpu.matmul %4, %13, %cst_20 {dimension_numbers = #tpu.dot_dimension_numbers<[1], [0], [0], [1], [0, 0, 1, 1], [], []>} : vector<2x4xf32>, vector<4x4xf32>, vector<2x4xf32> -> vector<2x4xf32>
    %15 = vector.extract_strided_slice %9 {offsets = [0, 0, 0], sizes = [1, 1, 4], strides = [1, 1, 1]} : vector<5x1x4xf32> to vector<1x1x4xf32>
    %16 = vector.shape_cast %15 : vector<1x1x4xf32> to vector<1x4xf32>
    %17 = vector.broadcast %16 : vector<1x4xf32> to vector<2x4xf32>
    %18 = arith.addf %14, %17 : vector<2x4xf32>
    %cst_21 = arith.constant dense<0.000000e+00> : vector<2xf32>
    %19 = vector.multi_reduction <add>, %18, %cst_21 [1] : vector<2x4xf32> to vector<2xf32>
    %20 = vector.shape_cast %19 : vector<2xf32> to vector<2x1xf32>
    %cst_22 = arith.constant 4.000000e+00 : f32
    %21 = vector.broadcast %cst_22 : f32 to vector<2x1xf32>
    %22 = arith.divf %20, %21 : vector<2x1xf32>
    %23 = vector.broadcast %22 : vector<2x1xf32> to vector<2x4xf32>
    %24 = arith.subf %18, %23 : vector<2x4xf32>
    %25 = arith.mulf %24, %24 : vector<2x4xf32>
    %cst_23 = arith.constant dense<0.000000e+00> : vector<2xf32>
    %26 = vector.multi_reduction <add>, %25, %cst_23 [1] : vector<2x4xf32> to vector<2xf32>
    %27 = vector.shape_cast %26 : vector<2xf32> to vector<2x1xf32>
    %cst_24 = arith.constant 4.000000e+00 : f32
    %28 = vector.broadcast %cst_24 : f32 to vector<2x1xf32>
    %29 = arith.divf %27, %28 : vector<2x1xf32>
    %30 = vector.broadcast %22 : vector<2x1xf32> to vector<2x4xf32>
    %31 = arith.subf %18, %30 : vector<2x4xf32>
    %cst_25 = arith.constant 9.99999974E-6 : f32
    %32 = vector.broadcast %cst_25 : f32 to vector<2x1xf32>
    %33 = arith.addf %29, %32 : vector<2x1xf32>
    %34 = math.rsqrt %33 : vector<2x1xf32>
    %35 = vector.broadcast %34 : vector<2x1xf32> to vector<2x4xf32>
    %36 = arith.mulf %31, %35 : vector<2x4xf32>
    %37 = vector.extract_strided_slice %10 {offsets = [0, 0, 0], sizes = [1, 1, 4], strides = [1, 1, 1]} : vector<5x1x4xf32> to vector<1x1x4xf32>
    %38 = vector.shape_cast %37 : vector<1x1x4xf32> to vector<1x4xf32>
    %39 = vector.broadcast %38 : vector<1x4xf32> to vector<2x4xf32>
    %40 = arith.mulf %36, %39 : vector<2x4xf32>
    %41 = vector.extract_strided_slice %11 {offsets = [0, 0, 0], sizes = [1, 1, 4], strides = [1, 1, 1]} : vector<5x1x4xf32> to vector<1x1x4xf32>
    %42 = vector.shape_cast %41 : vector<1x1x4xf32> to vector<1x4xf32>
    %43 = vector.broadcast %42 : vector<1x4xf32> to vector<2x4xf32>
    %44 = arith.addf %40, %43 : vector<2x4xf32>
    %cst_26 = arith.constant 0.000000e+00 : f32
    %45 = vector.broadcast %cst_26 : f32 to vector<2x4xf32>
    %46 = arith.maximumf %44, %45 : vector<2x4xf32>
    %cst_27 = arith.constant dense<0xFF800000> : vector<2xf32>
    %47 = vector.multi_reduction <maximumf>, %46, %cst_27 [1] : vector<2x4xf32> to vector<2xf32>
    %48 = vector.shape_cast %47 : vector<2xf32> to vector<2x1xf32>
    %49 = vector.broadcast %48 : vector<2x1xf32> to vector<2x4xf32>
    %50 = arith.subf %46, %49 : vector<2x4xf32>
    %51 = math.exp %50 : vector<2x4xf32>
    %cst_28 = arith.constant dense<0.000000e+00> : vector<2xf32>
    %52 = vector.multi_reduction <add>, %51, %cst_28 [1] : vector<2x4xf32> to vector<2xf32>
    %53 = vector.shape_cast %52 : vector<2xf32> to vector<2x1xf32>
    %54 = vector.broadcast %53 : vector<2x1xf32> to vector<2x4xf32>
    %55 = arith.divf %51, %54 : vector<2x4xf32>
    %56 = vector.extract_strided_slice %8 {offsets = [1, 0, 0], sizes = [1, 4, 4], strides = [1, 1, 1]} : vector<5x4x4xf32> to vector<1x4x4xf32>
    %57 = vector.shape_cast %56 : vector<1x4x4xf32> to vector<4x4xf32>
    %cst_29 = arith.constant dense<0.000000e+00> : vector<2x4xf32>
    %58 = tpu.matmul %7, %57, %cst_29 {dimension_numbers = #tpu.dot_dimension_numbers<[1], [0], [0], [1], [0, 0, 1, 1], [], []>} : vector<2x4xf32>, vector<4x4xf32>, vector<2x4xf32> -> vector<2x4xf32>
    %59 = vector.extract_strided_slice %9 {offsets = [1, 0, 0], sizes = [1, 1, 4], strides = [1, 1, 1]} : vector<5x1x4xf32> to vector<1x1x4xf32>
    %60 = vector.shape_cast %59 : vector<1x1x4xf32> to vector<1x4xf32>
    %61 = vector.broadcast %60 : vector<1x4xf32> to vector<2x4xf32>
    %62 = arith.addf %58, %61 : vector<2x4xf32>
    %cst_30 = arith.constant dense<0.000000e+00> : vector<2xf32>
    %63 = vector.multi_reduction <add>, %62, %cst_30 [1] : vector<2x4xf32> to vector<2xf32>
    %64 = vector.shape_cast %63 : vector<2xf32> to vector<2x1xf32>
    %cst_31 = arith.constant 4.000000e+00 : f32
    %65 = vector.broadcast %cst_31 : f32 to vector<2x1xf32>
    %66 = arith.divf %64, %65 : vector<2x1xf32>
    %67 = vector.broadcast %66 : vector<2x1xf32> to vector<2x4xf32>
    %68 = arith.subf %62, %67 : vector<2x4xf32>
    %69 = arith.mulf %68, %68 : vector<2x4xf32>
    %cst_32 = arith.constant dense<0.000000e+00> : vector<2xf32>
    %70 = vector.multi_reduction <add>, %69, %cst_32 [1] : vector<2x4xf32> to vector<2xf32>
    %71 = vector.shape_cast %70 : vector<2xf32> to vector<2x1xf32>
    %cst_33 = arith.constant 4.000000e+00 : f32
    %72 = vector.broadcast %cst_33 : f32 to vector<2x1xf32>
    %73 = arith.divf %71, %72 : vector<2x1xf32>
    %74 = vector.broadcast %66 : vector<2x1xf32> to vector<2x4xf32>
    %75 = arith.subf %62, %74 : vector<2x4xf32>
    %cst_34 = arith.constant 9.99999974E-6 : f32
    %76 = vector.broadcast %cst_34 : f32 to vector<2x1xf32>
    %77 = arith.addf %73, %76 : vector<2x1xf32>
    %78 = math.rsqrt %77 : vector<2x1xf32>
    %79 = vector.broadcast %78 : vector<2x1xf32> to vector<2x4xf32>
    %80 = arith.mulf %75, %79 : vector<2x4xf32>
    %81 = vector.extract_strided_slice %10 {offsets = [1, 0, 0], sizes = [1, 1, 4], strides = [1, 1, 1]} : vector<5x1x4xf32> to vector<1x1x4xf32>
    %82 = vector.shape_cast %81 : vector<1x1x4xf32> to vector<1x4xf32>
    %83 = vector.broadcast %82 : vector<1x4xf32> to vector<2x4xf32>
    %84 = arith.mulf %80, %83 : vector<2x4xf32>
    %85 = vector.extract_strided_slice %11 {offsets = [1, 0, 0], sizes = [1, 1, 4], strides = [1, 1, 1]} : vector<5x1x4xf32> to vector<1x1x4xf32>
    %86 = vector.shape_cast %85 : vector<1x1x4xf32> to vector<1x4xf32>
    %87 = vector.broadcast %86 : vector<1x4xf32> to vector<2x4xf32>
    %88 = arith.addf %84, %87 : vector<2x4xf32>
    %cst_35 = arith.constant 0.000000e+00 : f32
    %89 = vector.broadcast %cst_35 : f32 to vector<2x4xf32>
    %90 = arith.maximumf %88, %89 : vector<2x4xf32>
    %cst_36 = arith.constant dense<0xFF800000> : vector<2xf32>
    %91 = vector.multi_reduction <maximumf>, %90, %cst_36 [1] : vector<2x4xf32> to vector<2xf32>
    %92 = vector.shape_cast %91 : vector<2xf32> to vector<2x1xf32>
    %93 = vector.broadcast %92 : vector<2x1xf32> to vector<2x4xf32>
    %94 = arith.subf %90, %93 : vector<2x4xf32>
    %95 = math.exp %94 : vector<2x4xf32>
    %cst_37 = arith.constant dense<0.000000e+00> : vector<2xf32>
    %96 = vector.multi_reduction <add>, %95, %cst_37 [1] : vector<2x4xf32> to vector<2xf32>
    %97 = vector.shape_cast %96 : vector<2xf32> to vector<2x1xf32>
    %98 = vector.broadcast %97 : vector<2x1xf32> to vector<2x4xf32>
    %99 = arith.divf %95, %98 : vector<2x4xf32>
    %100 = arith.addf %4, %7 : vector<2x4xf32>
    %101 = vector.extract_strided_slice %8 {offsets = [2, 0, 0], sizes = [1, 4, 4], strides = [1, 1, 1]} : vector<5x4x4xf32> to vector<1x4x4xf32>
    %102 = vector.shape_cast %101 : vector<1x4x4xf32> to vector<4x4xf32>
    %cst_38 = arith.constant dense<0.000000e+00> : vector<2x4xf32>
    %103 = tpu.matmul %100, %102, %cst_38 {dimension_numbers = #tpu.dot_dimension_numbers<[1], [0], [0], [1], [0, 0, 1, 1], [], []>} : vector<2x4xf32>, vector<4x4xf32>, vector<2x4xf32> -> vector<2x4xf32>
    %104 = vector.extract_strided_slice %9 {offsets = [2, 0, 0], sizes = [1, 1, 4], strides = [1, 1, 1]} : vector<5x1x4xf32> to vector<1x1x4xf32>
    %105 = vector.shape_cast %104 : vector<1x1x4xf32> to vector<1x4xf32>
    %106 = vector.broadcast %105 : vector<1x4xf32> to vector<2x4xf32>
    %107 = arith.addf %103, %106 : vector<2x4xf32>
    %cst_39 = arith.constant dense<0.000000e+00> : vector<2xf32>
    %108 = vector.multi_reduction <add>, %107, %cst_39 [1] : vector<2x4xf32> to vector<2xf32>
    %109 = vector.shape_cast %108 : vector<2xf32> to vector<2x1xf32>
    %cst_40 = arith.constant 4.000000e+00 : f32
    %110 = vector.broadcast %cst_40 : f32 to vector<2x1xf32>
    %111 = arith.divf %109, %110 : vector<2x1xf32>
    %112 = vector.broadcast %111 : vector<2x1xf32> to vector<2x4xf32>
    %113 = arith.subf %107, %112 : vector<2x4xf32>
    %114 = arith.mulf %113, %113 : vector<2x4xf32>
    %cst_41 = arith.constant dense<0.000000e+00> : vector<2xf32>
    %115 = vector.multi_reduction <add>, %114, %cst_41 [1] : vector<2x4xf32> to vector<2xf32>
    %116 = vector.shape_cast %115 : vector<2xf32> to vector<2x1xf32>
    %cst_42 = arith.constant 4.000000e+00 : f32
    %117 = vector.broadcast %cst_42 : f32 to vector<2x1xf32>
    %118 = arith.divf %116, %117 : vector<2x1xf32>
    %119 = vector.broadcast %111 : vector<2x1xf32> to vector<2x4xf32>
    %120 = arith.subf %107, %119 : vector<2x4xf32>
    %cst_43 = arith.constant 9.99999974E-6 : f32
    %121 = vector.broadcast %cst_43 : f32 to vector<2x1xf32>
    %122 = arith.addf %118, %121 : vector<2x1xf32>
    %123 = math.rsqrt %122 : vector<2x1xf32>
    %124 = vector.broadcast %123 : vector<2x1xf32> to vector<2x4xf32>
    %125 = arith.mulf %120, %124 : vector<2x4xf32>
    %126 = vector.extract_strided_slice %10 {offsets = [2, 0, 0], sizes = [1, 1, 4], strides = [1, 1, 1]} : vector<5x1x4xf32> to vector<1x1x4xf32>
    %127 = vector.shape_cast %126 : vector<1x1x4xf32> to vector<1x4xf32>
    %128 = vector.broadcast %127 : vector<1x4xf32> to vector<2x4xf32>
    %129 = arith.mulf %125, %128 : vector<2x4xf32>
    %130 = vector.extract_strided_slice %11 {offsets = [2, 0, 0], sizes = [1, 1, 4], strides = [1, 1, 1]} : vector<5x1x4xf32> to vector<1x1x4xf32>
    %131 = vector.shape_cast %130 : vector<1x1x4xf32> to vector<1x4xf32>
    %132 = vector.broadcast %131 : vector<1x4xf32> to vector<2x4xf32>
    %133 = arith.addf %129, %132 : vector<2x4xf32>
    %cst_44 = arith.constant 0.000000e+00 : f32
    %134 = vector.broadcast %cst_44 : f32 to vector<2x4xf32>
    %135 = arith.maximumf %133, %134 : vector<2x4xf32>
    %136 = vector.extract_strided_slice %8 {offsets = [3, 0, 0], sizes = [1, 4, 4], strides = [1, 1, 1]} : vector<5x4x4xf32> to vector<1x4x4xf32>
    %137 = vector.shape_cast %136 : vector<1x4x4xf32> to vector<4x4xf32>
    %cst_45 = arith.constant dense<0.000000e+00> : vector<2x4xf32>
    %138 = tpu.matmul %135, %137, %cst_45 {dimension_numbers = #tpu.dot_dimension_numbers<[1], [0], [0], [1], [0, 0, 1, 1], [], []>} : vector<2x4xf32>, vector<4x4xf32>, vector<2x4xf32> -> vector<2x4xf32>
    %139 = vector.extract_strided_slice %9 {offsets = [3, 0, 0], sizes = [1, 1, 4], strides = [1, 1, 1]} : vector<5x1x4xf32> to vector<1x1x4xf32>
    %140 = vector.shape_cast %139 : vector<1x1x4xf32> to vector<1x4xf32>
    %141 = vector.broadcast %140 : vector<1x4xf32> to vector<2x4xf32>
    %142 = arith.addf %138, %141 : vector<2x4xf32>
    %cst_46 = arith.constant dense<0.000000e+00> : vector<2xf32>
    %143 = vector.multi_reduction <add>, %142, %cst_46 [1] : vector<2x4xf32> to vector<2xf32>
    %144 = vector.shape_cast %143 : vector<2xf32> to vector<2x1xf32>
    %cst_47 = arith.constant 4.000000e+00 : f32
    %145 = vector.broadcast %cst_47 : f32 to vector<2x1xf32>
    %146 = arith.divf %144, %145 : vector<2x1xf32>
    %147 = vector.broadcast %146 : vector<2x1xf32> to vector<2x4xf32>
    %148 = arith.subf %142, %147 : vector<2x4xf32>
    %149 = arith.mulf %148, %148 : vector<2x4xf32>
    %cst_48 = arith.constant dense<0.000000e+00> : vector<2xf32>
    %150 = vector.multi_reduction <add>, %149, %cst_48 [1] : vector<2x4xf32> to vector<2xf32>
    %151 = vector.shape_cast %150 : vector<2xf32> to vector<2x1xf32>
    %cst_49 = arith.constant 4.000000e+00 : f32
    %152 = vector.broadcast %cst_49 : f32 to vector<2x1xf32>
    %153 = arith.divf %151, %152 : vector<2x1xf32>
    %154 = vector.broadcast %146 : vector<2x1xf32> to vector<2x4xf32>
    %155 = arith.subf %142, %154 : vector<2x4xf32>
    %cst_50 = arith.constant 9.99999974E-6 : f32
    %156 = vector.broadcast %cst_50 : f32 to vector<2x1xf32>
    %157 = arith.addf %153, %156 : vector<2x1xf32>
    %158 = math.rsqrt %157 : vector<2x1xf32>
    %159 = vector.broadcast %158 : vector<2x1xf32> to vector<2x4xf32>
    %160 = arith.mulf %155, %159 : vector<2x4xf32>
    %161 = vector.extract_strided_slice %10 {offsets = [3, 0, 0], sizes = [1, 1, 4], strides = [1, 1, 1]} : vector<5x1x4xf32> to vector<1x1x4xf32>
    %162 = vector.shape_cast %161 : vector<1x1x4xf32> to vector<1x4xf32>
    %163 = vector.broadcast %162 : vector<1x4xf32> to vector<2x4xf32>
    %164 = arith.mulf %160, %163 : vector<2x4xf32>
    %165 = vector.extract_strided_slice %11 {offsets = [3, 0, 0], sizes = [1, 1, 4], strides = [1, 1, 1]} : vector<5x1x4xf32> to vector<1x1x4xf32>
    %166 = vector.shape_cast %165 : vector<1x1x4xf32> to vector<1x4xf32>
    %167 = vector.broadcast %166 : vector<1x4xf32> to vector<2x4xf32>
    %168 = arith.addf %164, %167 : vector<2x4xf32>
    %cst_51 = arith.constant 0.000000e+00 : f32
    %169 = vector.broadcast %cst_51 : f32 to vector<2x4xf32>
    %170 = arith.maximumf %168, %169 : vector<2x4xf32>
    %171 = vector.extract_strided_slice %8 {offsets = [4, 0, 0], sizes = [1, 4, 4], strides = [1, 1, 1]} : vector<5x4x4xf32> to vector<1x4x4xf32>
    %172 = vector.shape_cast %171 : vector<1x4x4xf32> to vector<4x4xf32>
    %cst_52 = arith.constant dense<0.000000e+00> : vector<2x4xf32>
    %173 = tpu.matmul %135, %172, %cst_52 {dimension_numbers = #tpu.dot_dimension_numbers<[1], [0], [0], [1], [0, 0, 1, 1], [], []>} : vector<2x4xf32>, vector<4x4xf32>, vector<2x4xf32> -> vector<2x4xf32>
    %174 = vector.extract_strided_slice %9 {offsets = [4, 0, 0], sizes = [1, 1, 4], strides = [1, 1, 1]} : vector<5x1x4xf32> to vector<1x1x4xf32>
    %175 = vector.shape_cast %174 : vector<1x1x4xf32> to vector<1x4xf32>
    %176 = vector.broadcast %175 : vector<1x4xf32> to vector<2x4xf32>
    %177 = arith.addf %173, %176 : vector<2x4xf32>
    %cst_53 = arith.constant dense<0.000000e+00> : vector<2xf32>
    %178 = vector.multi_reduction <add>, %177, %cst_53 [1] : vector<2x4xf32> to vector<2xf32>
    %179 = vector.shape_cast %178 : vector<2xf32> to vector<2x1xf32>
    %cst_54 = arith.constant 4.000000e+00 : f32
    %180 = vector.broadcast %cst_54 : f32 to vector<2x1xf32>
    %181 = arith.divf %179, %180 : vector<2x1xf32>
    %182 = vector.broadcast %181 : vector<2x1xf32> to vector<2x4xf32>
    %183 = arith.subf %177, %182 : vector<2x4xf32>
    %184 = arith.mulf %183, %183 : vector<2x4xf32>
    %cst_55 = arith.constant dense<0.000000e+00> : vector<2xf32>
    %185 = vector.multi_reduction <add>, %184, %cst_55 [1] : vector<2x4xf32> to vector<2xf32>
    %186 = vector.shape_cast %185 : vector<2xf32> to vector<2x1xf32>
    %cst_56 = arith.constant 4.000000e+00 : f32
    %187 = vector.broadcast %cst_56 : f32 to vector<2x1xf32>
    %188 = arith.divf %186, %187 : vector<2x1xf32>
    %189 = vector.broadcast %181 : vector<2x1xf32> to vector<2x4xf32>
    %190 = arith.subf %177, %189 : vector<2x4xf32>
    %cst_57 = arith.constant 9.99999974E-6 : f32
    %191 = vector.broadcast %cst_57 : f32 to vector<2x1xf32>
    %192 = arith.addf %188, %191 : vector<2x1xf32>
    %193 = math.rsqrt %192 : vector<2x1xf32>
    %194 = vector.broadcast %193 : vector<2x1xf32> to vector<2x4xf32>
    %195 = arith.mulf %190, %194 : vector<2x4xf32>
    %196 = vector.extract_strided_slice %10 {offsets = [4, 0, 0], sizes = [1, 1, 4], strides = [1, 1, 1]} : vector<5x1x4xf32> to vector<1x1x4xf32>
    %197 = vector.shape_cast %196 : vector<1x1x4xf32> to vector<1x4xf32>
    %198 = vector.broadcast %197 : vector<1x4xf32> to vector<2x4xf32>
    %199 = arith.mulf %195, %198 : vector<2x4xf32>
    %200 = vector.extract_strided_slice %11 {offsets = [4, 0, 0], sizes = [1, 1, 4], strides = [1, 1, 1]} : vector<5x1x4xf32> to vector<1x1x4xf32>
    %201 = vector.shape_cast %200 : vector<1x1x4xf32> to vector<1x4xf32>
    %202 = vector.broadcast %201 : vector<1x4xf32> to vector<2x4xf32>
    %203 = arith.addf %199, %202 : vector<2x4xf32>
    %cst_58 = arith.constant 0.000000e+00 : f32
    %204 = vector.broadcast %cst_58 : f32 to vector<2x4xf32>
    %205 = arith.maximumf %203, %204 : vector<2x4xf32>
    %206 = arith.maximumf %170, %205 : vector<2x4xf32>
    %207 = arith.subf %170, %206 : vector<2x4xf32>
    %208 = math.exp %207 : vector<2x4xf32>
    %209 = arith.subf %205, %206 : vector<2x4xf32>
    %210 = math.exp %209 : vector<2x4xf32>
    %211 = arith.addf %208, %210 : vector<2x4xf32>
    %cst_59 = arith.constant 1.000000e+00 : f32
    %212 = vector.broadcast %cst_59 : f32 to vector<2x4xf32>
    %213 = arith.divf %212, %211 : vector<2x4xf32>
    %214 = arith.mulf %208, %213 : vector<2x4xf32>
    %215 = arith.addf %214, %55 : vector<2x4xf32>
    %216 = arith.mulf %210, %213 : vector<2x4xf32>
    %217 = arith.addf %216, %99 : vector<2x4xf32>
    %218 = vector.shape_cast %215 : vector<2x4xf32> to vector<2x4x1xf32>
    %219 = vector.broadcast %218 : vector<2x4x1xf32> to vector<2x4x256xf32>
    %220 = arith.mulf %0, %219 : vector<2x4x256xf32>
    %221 = vector.shape_cast %217 : vector<2x4xf32> to vector<2x4x1xf32>
    %222 = vector.broadcast %221 : vector<2x4x1xf32> to vector<2x4x256xf32>
    %223 = arith.mulf %1, %222 : vector<2x4x256xf32>
    %224 = arith.addf %220, %223 : vector<2x4x256xf32>
    %c0_60 = arith.constant 0 : index
    %c0_61 = arith.constant 0 : index
    %c0_62 = arith.constant 0 : index
    %225 = vector.load %arg6[%c0_60, %c0_61, %c0_62] : memref<2x4x256xf32, #tpu.memory_space<vmem>>, vector<2x4x256xf32>
    tpu.vector_store %arg6[%c0_60, %c0_61, %c0_62], %224 {strides = array<i32>} : memref<2x4x256xf32, #tpu.memory_space<vmem>>, vector<2x4x256xf32>,
    return
  }
}

</mosaic_0001>

<bundles_post_ra>
// kernel: tpu_custom_call.1
= control target key start
LH: loop header
LB: loop body
LE: loop exit
PB: predicated region body
PF: predicated region fallthrough
CT: control target
= control target key end

     0   :  { %vm34_vm0 = vcmask 1043456   ;;  %s1107_s0 = inlined_call_operand.vmem [shape: f32[2,4,256], index: 0, kind: input, shape index: {}]   ;;  %s1108_s1 = inlined_call_operand.vmem [shape: f32[2,4,256], index: 1, kind: input, shape index: {}]   ;;  %s1109_s2 = inlined_call_operand.vmem [shape: f32[5,4,4], index: 2, kind: input, shape index: {}]   ;;  %s1110_s3 = inlined_call_operand.vmem [shape: f32[5,1,4], index: 3, kind: input, shape index: {}]   ;;  %s1111_s4 = inlined_call_operand.vmem [shape: f32[5,1,4], index: 4, kind: input, shape index: {}]   ;;  %s1112_s5 = inlined_call_operand.vmem [shape: f32[5,1,4], index: 5, kind: input, shape index: {}]   ;;  %s1113_s6 = inlined_call_operand.hbm [shape: f32[2,4,256], index: 6, kind: output, shape index: {}]  }
   0x1   :  { %v956_v0 = vld [vmem:[%s1108_s1] sm:$0xff]  ;;  %v966_v2 = vld [vmem:[%s1108_s1 + $0x8] sm:$0xff] }
   0x2   :  { %v961_v1 = vld [vmem:[%s1107_s0] sm:$0xff]  ;;  %v49_v3 = vcombine.high %v956_v0, %v956_v0  ;;  %v53_v4 = vsel %vm34_vm0, %v956_v0, 0.0  ;;  %v979_v7 = vld [vmem:[%s1107_s0 + $0x8] sm:$0xff] }
   0x3   :  { %v30_v5 = vcombine.high %v961_v1, %v961_v1  ;;  %v35_v6 = vsel %vm34_vm0, %v961_v1, 0.0 }
   0x4   :  { %11 = vsyncpa [#allocation3], 0  ;;  %v50_v8 = vcombine.high %v966_v2, %v966_v2  ;;  %v31_v9 = vcombine.high %v979_v7, %v979_v7  ;;  %v54_v10 = vsel %vm34_vm0, %v49_v3, 0.0  ;;  %v58_v12 = vsel %vm34_vm0, %v966_v2, 0.0  ;;  %v65_v21 = vld [vmem:[%s1109_s2] sm:$0xf] }
   0x5   :  { %v36_v11 = vsel %vm34_vm0, %v30_v5, 0.0  ;;  %v40_v13 = vsel %vm34_vm0, %v979_v7, 0.0  ;;  %v55_v14 = vadd.f32 %v54_v10, %v53_v4  ;;  %v912_v20 = vmov 0.0   ;;  %v66_v22 = vld [vmem:[%s1109_s2 + $0x4] sm:$0xf] }
   0x6   :  { %v37_v15 = vadd.f32 %v36_v11, %v35_v6  ;;  %v59_v16 = vsel %vm34_vm0, %v50_v8, 0.0  ;;  %v41_v17 = vsel %vm34_vm0, %v31_v9, 0.0  ;;  %829 = vmatprep.subr.mxu0 %v912_v20  ;;  %834 = vmatprep.subr.mxu1 %v912_v20  ;;  %vm913_vm1 = vmmov 0   ;;  %v67_v41 = vld [vmem:[%s1109_s2 + $0x8] sm:$0xf] }
   0x7   :  { %56 = vadd.xlane.f32.xlu1 %v55_v14  ;;  %v60_v18 = vadd.f32 %v59_v16, %v58_v12  ;;  %v42_v19 = vadd.f32 %v41_v17, %v40_v13  ;;  %830 = vmatpush3.msk.msra.mxu0 %vm34_vm0, %v65_v21  ;;  %v93_v23 = vlaneseq  ;;  %vm103_vm2 = vcmask 1041409   ;;  %v804_v51 = vld [vmem:[%s1110_s3 + $0x2] ss:$0 sm:$0xff]  ;;  %v794_v52 = vld [vmem:[%s1110_s3] ss:$0 sm:$0xff] }
   0x8   :  { %38 = vadd.xlane.f32.xlu0 %v37_v15  ;;  %831 = vmatprep.mubr.msk.f32.mxu0 %vm913_vm1, %v912_v20  ;;  %vm105_vm3 = vcmask 31744   ;;  %vm181_vm4 = vcmask 25600   ;;  %v799_v62 = vld [vmem:[%s1110_s3 + $0x1] ss:$0 sm:$0xff]  ;;  %v68_v12 = vld [vmem:[%s1109_s2 + $0xc] sm:$0xf] }
   0x9   :  { %835 = vmatpush3.msk.msra.mxu1 %vm34_vm0, %v66_v22  ;;  %836 = vmatprep.mubr.msk.f32.mxu1 %vm913_vm1, %v912_v20  ;;  %v94_v24 = vand.u32 127, %v93_v23  ;;  %v1003_v25 = vshrl.u32 %v93_v23, 7  ;;  %v69_v13 = vld [vmem:[%s1109_s2 + $0x10] sm:$0xf]  ;;  %v807_v23 = vld [vmem:[%s1111_s4 + $0x2] ss:$0 sm:$0xff] }
   0xa   :  { %839 = vmatprep.subr.mxu0 %v912_v20  ;;  %844 = vmatprep.subr.mxu1 %v912_v20 }
   0xb   :  { %61 = vadd.xlane.f32.xlu1 %v60_v18  ;;  %v97_v28 = vsub.s32 %v94_v24, %v1003_v25 }
   0xc   :  { %43 = vadd.xlane.f32.xlu0 %v42_v19 }
  0x94   :  { %v57_v26 = vpop.xlane.xlu1 %56 }
  0x95   :  { %v39_v27 = vpop.xlane.xlu0 %38  ;;  %v63_v30 = vmul.f32 0.00390625, %v57_v26  ;;  %v808_v26 = vld [vmem:[%s1112_s5 + $0x2] ss:$0 sm:$0xff] }
  0x96   :  { %v45_v29 = vmul.f32 0.00390625, %v39_v27 }
  0x97   :  { %v233_v35 = vrot.slane %v63_v30, %v97_v28 }
  0x98   :  { %v62_v31 = vpop.xlane.xlu1 %61  ;;  %v98_v36 = vrot.slane %v45_v29, %v97_v28  ;;  %v353_v37 = vadd.f32 %v63_v30, %v45_v29 }
  0x99   :  { %v44_v32 = vpop.xlane.xlu0 %43  ;;  %v64_v33 = vmul.f32 0.00390625, %v62_v31 }
  0x9a   :  { %v46_v34 = vmul.f32 0.00390625, %v44_v32  ;;  %v366_v45 = vrot.slane %v353_v37, %v97_v28 }
  0x9b   :  { %v237_v38 = vrot.slane %v64_v33, %v97_v28 }
  0x9c   :  { %v102_v39 = vrot.slane %v46_v34, %v97_v28  ;;  %v354_v40 = vadd.f32 %v64_v33, %v46_v34 }
  0x9d   :  { %v238_v44 = vsel %vm103_vm2, %v237_v38, %v233_v35 }
  0x9e   :  { %v370_v42 = vrot.slane %v354_v40, %v97_v28  ;;  %v104_v43 = vsel %vm103_vm2, %v102_v39, %v98_v36  ;;  %837 = vmatmul.mubr.msk.f32.vlgmr.msra.gmra.mrb[0].mxu1 %vm105_vm3, %v238_v44  ;;  %v797_v40 = vld [vmem:[%s1111_s4] ss:$0 sm:$0xff] }
  0x9f   :  { %832 = vmatmul.mubr.msk.f32.vlgmr.msra.gmra.mrb[0].mxu0 %vm105_vm3, %v104_v43  ;;  %846 = vmatprep.mubr.msk.f32.mxu1 %vm913_vm1, %v912_v20  ;;  %v798_v44 = vld [vmem:[%s1112_s5] ss:$0 sm:$0xff] }
  0xa0   :  { %840 = vmatpush3.msk.msra.mxu0 %vm34_vm0, %v67_v41  ;;  %841 = vmatprep.mubr.msk.f32.mxu0 %vm913_vm1, %v912_v20  ;;  %v371_v46 = vsel %vm103_vm2, %v370_v42, %v366_v45  ;;  %v802_v41 = vld [vmem:[%s1111_s4 + $0x1] ss:$0 sm:$0xff] }
  0xa1   :  { %849 = vmatprep.subr.mxu0 %v912_v20  ;;  %845 = vmatpush3.msk.msra.mxu1 %vm34_vm0, %v68_v12  ;;  %v803_v45 = vld [vmem:[%s1112_s5 + $0x1] ss:$0 sm:$0xff] }
  0xa3   :  { %842 = vmatmul.mubr.msk.f32.vlgmr.msra.gmra.mrb[2].mxu0 %vm105_vm3, %v371_v46  ;;  %v809_v46 = vld [vmem:[%s1110_s3 + $0x3] ss:$0 sm:$0xff] }
  0xa4   :  { %851 = vmatprep.mubr.msk.f32.mxu0 %vm913_vm1, %v912_v20  ;;  %850 = vmatpush3.msk.msra.mxu0 %vm34_vm0, %v69_v13 }
 0x171   :  { %v310_v48 = vpop.f32.mrb[0].mxu1 }
 0x172   :  { %v177_v47 = vpop.f32.mrb[0].mxu0  ;;  %v838_v50 = vpop.f32.mrb[1].mxu1  ;;  %v311_v5 = vadd.f32 %v799_v62, %v310_v48 }
 0x173   :  { %v833_v49 = vpop.f32.mrb[1].mxu0  ;;  %v178_v56 = vadd.f32 %v794_v52, %v177_v47  ;;  %v814_v47 = vld [vmem:[%s1110_s3 + $0x4] ss:$0 sm:$0xff] }
 0x174   :  { %v314_v10 = vsel %vm181_vm4, %v311_v5, 0.0 }
 0x175   :  { %v182_v58 = vsel %vm181_vm4, %v178_v56, 0.0 }
 0x176   :  { %v443_v53 = vpop.f32.mrb[2].mxu0 }
 0x177   :  { %v444_v54 = vadd.f32 %v804_v51, %v443_v53  ;;  %v843_v55 = vpop.f32.mrb[3].mxu0 }
 0x179   :  { %v447_v57 = vsel %vm181_vm4, %v444_v54, 0.0 }
 0x17a   :  { %448 = vadd.xlane.f32.xlu0 %v447_v57 }
 0x17e   :  { %183 = vadd.xlane.f32.xlu0 %v182_v58 }
 0x207   :  { %v449_v59 = vpop.xlane.xlu0 %448 }
 0x208   :  { %v450_v60 = vmul.f32 0.25, %v449_v59 }
 0x20a   :  { %v451_v61 = vsub.f32 %v444_v54, %v450_v60 }
 0x20b   :  { %v184_v63 = vpop.xlane.xlu0 %183 }
 0x20c   :  { %v186_v3 = vmul.f32 0.25, %v184_v63  ;;  %v452_v4 = vmul.f32 %v451_v61, %v451_v61 }
 0x20e   :  { %v187_v6 = vsub.f32 %v178_v56, %v186_v3  ;;  %v453_v8 = vsel %vm181_vm4, %v452_v4, 0.0 }
 0x20f   :  { %454 = vadd.xlane.f32.xlu1 %v453_v8 }
 0x210   :  { %v188_v9 = vmul.f32 %v187_v6, %v187_v6 }
 0x212   :  { %v189_v11 = vsel %vm181_vm4, %v188_v9, 0.0 }
 0x213   :  { %315 = vadd.xlane.f32.xlu1 %v314_v10  ;;  %190 = vadd.xlane.f32.xlu0 %v189_v11 }
 0x29c   :  { %v455_v14 = vpop.xlane.xlu1 %454 }
 0x29d   :  { %v456_v15 = vmul.f32 0.25, %v455_v14 }
 0x29f   :  { %v457_v16 = vadd.f32 1e-05, %v456_v15 }
 0x2a0   :  { %v316_v17 = vpop.xlane.xlu1 %315  ;;  %v191_v30 = vpop.xlane.xlu0 %190 }
 0x2a1   :  { %864 = vrsqrt.f32 %v457_v16  ;;  %v317_v18 = vmul.f32 0.25, %v316_v17  ;;  %v192_v32 = vmul.f32 0.25, %v191_v30  ;;  %v812_v30 = vld [vmem:[%s1111_s4 + $0x3] ss:$0 sm:$0xff] }
 0x2a3   :  { %v318_v19 = vsub.f32 %v311_v5, %v317_v18  ;;  %v193_v34 = vadd.f32 1e-05, %v192_v32 }
 0x2a5   :  { %v319_v20 = vmul.f32 %v318_v19, %v318_v19  ;;  %866 = vrsqrt.f32 %v193_v34  ;;  %v813_v34 = vld [vmem:[%s1112_s5 + $0x3] ss:$0 sm:$0xff] }
 0x2a7   :  { %v320_v21 = vsel %vm181_vm4, %v319_v20, 0.0 }
 0x2a8   :  { %321 = vadd.xlane.f32.xlu1 %v320_v21 }
 0x2ab   :  { %v865_v22 = vpop.eup %864 }
 0x2ac   :  { %v459_v24 = vmul.f32 %v865_v22, %v451_v61 }
 0x2ae   :  { %v466_v27 = vmul.f32 %v807_v23, %v459_v24 }
 0x2af   :  { %v867_v36 = vpop.eup %866 }
 0x2b0   :  { %v473_v28 = vadd.f32 %v808_v26, %v466_v27  ;;  %v195_v38 = vmul.f32 %v867_v36, %v187_v6 }
 0x2b2   :  { %v474_v29 = vmax.f32 %v473_v28, 0.0  ;;  %v202_v42 = vmul.f32 %v797_v40, %v195_v38 }
 0x2b4   :  { %847 = vmatmul.mubr.msk.f32.vlgmr.msra.gmra.mrb[2].mxu1 %vm105_vm3, %v474_v29  ;;  %852 = vmatmul.mubr.msk.f32.vlgmr.msra.gmra.mrb[4].mxu0 %vm105_vm3, %v474_v29  ;;  %v209_v48 = vadd.f32 %v798_v44, %v202_v42 }
 0x2b6   :  { %v210_v58 = vmax.f32 %v209_v48, 0.0 }
 0x2b8   :  { %v211_v60 = vsel %vm181_vm4, %v210_v58, -inf }
 0x335   :  { %v322_v31 = vpop.xlane.xlu1 %321 }
 0x336   :  { %v323_v33 = vmul.f32 0.25, %v322_v31 }
 0x338   :  { %v324_v35 = vadd.f32 1e-05, %v323_v33  ;;  %v817_v33 = vld [vmem:[%s1111_s4 + $0x4] ss:$0 sm:$0xff]  ;;  %s915_s4 = smov [#allocation2]  }
 0x33a   :  { %868 = vrsqrt.f32 %v324_v35 }
 0x344   :  { %v869_v37 = vpop.eup %868 }
 0x345   :  { %v326_v39 = vmul.f32 %v869_v37, %v318_v19  ;;  %v818_v37 = vld [vmem:[%s1112_s5 + $0x4] ss:$0 sm:$0xff]  ;;  %s783_s5 = sshll.u32 %s915_s4, 4  ;;  %s784_s5 = int_to_ptr.vmem [resolvable:$true] %s783_s5 }
 0x346   :  { %s888_s15 = scalar_lea.vmem %s784_s5, 256  ;;  %p893_p1 = scmp.lt.s32.totalorder %s784_s5, %s784_s5 }
 0x347   :  { %v333_v43 = vmul.f32 %v802_v41, %v326_v39  ;;  %p889_p0 = scmp.ne.s32.totalorder %s784_s5, %s888_s15  ;;  %p894_p2 = scmp.lt.s32.totalorder %s888_s15, %s888_s15 }
 0x349   :  { %v340_v49 = vadd.f32 %v803_v45, %v333_v43  ;;  %p895_p3 = por %p894_p2, %p893_p1 }
 0x34b   :  { %v341_v59 = vmax.f32 %v340_v49, 0.0  ;;  %p896_p4 = pnand %p895_p3, %p889_p0 }
 0x34d   :  { %v342_v61 = vsel %vm181_vm4, %v341_v59, -inf }
 0x387   :  { %v553_v50 = vpop.f32.mrb[2].mxu1  ;;  %v660_v51 = vpop.f32.mrb[4].mxu0 }
 0x388   :  { %v554_v52 = vadd.f32 %v809_v46, %v553_v50  ;;  %v661_v53 = vadd.f32 %v814_v47, %v660_v51  ;;  %v848_v54 = vpop.f32.mrb[3].mxu1  ;;  %v853_v55 = vpop.f32.mrb[5].mxu0 }
 0x38a   :  { %v557_v56 = vsel %vm181_vm4, %v554_v52, 0.0  ;;  %v664_v57 = vsel %vm181_vm4, %v661_v53, 0.0 }
 0x38b   :  { %558 = vadd.xlane.f32.xlu0 %v557_v56  ;;  %665 = vadd.xlane.f32.xlu1 %v664_v57  ;;  %v715_v56 = vsub.s32 1, %v1003_v25 }
 0x38f   :  { %212 = vmax.xlane.f32.xlu0 %v211_v60  ;;  %343 = vmax.xlane.f32.xlu1 %v342_v61 }
 0x418   :  { %v559_v62 = vpop.xlane.xlu0 %558  ;;  %v666_v63 = vpop.xlane.xlu1 %665 }
 0x419   :  { %v560_v3 = vmul.f32 0.25, %v559_v62  ;;  %v667_v4 = vmul.f32 0.25, %v666_v63 }
 0x41b   :  { %v561_v5 = vsub.f32 %v554_v52, %v560_v3  ;;  %v668_v6 = vsub.f32 %v661_v53, %v667_v4 }
 0x41c   :  { %v213_v8 = vpop.xlane.xlu0 %212  ;;  %v344_v9 = vpop.xlane.xlu1 %343 }
 0x41d   :  { %v214_v10 = vsub.f32 %v210_v58, %v213_v8  ;;  %v345_v11 = vsub.f32 %v341_v59, %v344_v9  ;;  %v562_v12 = vmul.f32 %v561_v5, %v561_v5  ;;  %v669_v13 = vmul.f32 %v668_v6, %v668_v6 }
 0x41e   :  { %v708_v59 = vsub.s32 0, %v1003_v25  ;;  %v914_v8 = vmov 839922192  }
 0x41f   :  { %v215_v14 = vmul.f32 1.442695, %v214_v10  ;;  %v346_v15 = vmul.f32 1.442695, %v345_v11  ;;  %v563_v16 = vsel %vm181_vm4, %v562_v12, 0.0  ;;  %v670_v17 = vsel %vm181_vm4, %v669_v13, 0.0 }
 0x420   :  { %564 = vadd.xlane.f32.xlu0 %v563_v16  ;;  %671 = vadd.xlane.f32.xlu1 %v670_v17  ;;  %v723_v9 = vunpack.c.l.s4 %v914_v8 }
 0x421   :  { %870 = vpow2.f32 %v215_v14 }
 0x422   :  { %872 = vpow2.f32 %v346_v15  ;;  %v724_v10 = vunpack.c.0.s8 %v723_v9 }
 0x424   :  { %v727_v11 = vsub.s32 %v724_v10, %v1003_v25 }
 0x42b   :  { %v871_v18 = vpop.eup %870 }
 0x42c   :  { %v873_v19 = vpop.eup %872  ;;  %v217_v20 = vsel %vm181_vm4, %v871_v18, 0.0 }
 0x42d   :  { %218 = vadd.xlane.f32.xlu0 %v217_v20  ;;  %v348_v21 = vsel %vm181_vm4, %v873_v19, 0.0 }
 0x42e   :  { %349 = vadd.xlane.f32.xlu1 %v348_v21 }
 0x4ad   :  { %v565_v22 = vpop.xlane.xlu0 %564  ;;  %v672_v23 = vpop.xlane.xlu1 %671 }
 0x4ae   :  { %v566_v24 = vmul.f32 0.25, %v565_v22  ;;  %v673_v26 = vmul.f32 0.25, %v672_v23 }
 0x4b0   :  { %v567_v27 = vadd.f32 1e-05, %v566_v24  ;;  %v674_v28 = vadd.f32 1e-05, %v673_v26 }
 0x4b2   :  { %874 = vrsqrt.f32 %v567_v27 }
 0x4b3   :  { %876 = vrsqrt.f32 %v674_v28 }
 0x4ba   :  { %v219_v48 = vpop.xlane.xlu0 %218 }
 0x4bb   :  { %v350_v50 = vpop.xlane.xlu1 %349 }
 0x4bc   :  { %v875_v29 = vpop.eup %874 }
 0x4bd   :  { %v877_v31 = vpop.eup %876  ;;  %v569_v32 = vmul.f32 %v875_v29, %v561_v5 }
 0x4be   :  { %v676_v35 = vmul.f32 %v877_v31, %v668_v6 }
 0x4bf   :  { %v576_v36 = vmul.f32 %v812_v30, %v569_v32 }
 0x4c0   :  { %v683_v38 = vmul.f32 %v817_v33, %v676_v35 }
 0x4c1   :  { %v583_v39 = vadd.f32 %v813_v34, %v576_v36 }
 0x4c2   :  { %v690_v40 = vadd.f32 %v818_v37, %v683_v38 }
 0x4c3   :  { %v584_v41 = vmax.f32 %v583_v39, 0.0 }
 0x4c4   :  { %v691_v42 = vmax.f32 %v690_v40, 0.0 }
 0x4c6   :  { %v692_v43 = vmax.f32 %v584_v41, %v691_v42 }
 0x4c8   :  { %v696_v44 = vsub.f32 %v691_v42, %v692_v43  ;;  %v693_v45 = vsub.f32 %v584_v41, %v692_v43 }
 0x4ca   :  { %v697_v46 = vmul.f32 1.442695, %v696_v44  ;;  %v694_v47 = vmul.f32 1.442695, %v693_v45 }
 0x4cc   :  { %878 = vpow2.f32 %v697_v46 }
 0x4cd   :  { %880 = vpow2.f32 %v694_v47 }
 0x4ce   :  { %882 = vrcp.f32 %v219_v48 }
 0x4cf   :  { %884 = vrcp.f32 %v350_v50 }
 0x4d6   :  { %v879_v49 = vpop.eup %878 }
 0x4d7   :  { %v881_v51 = vpop.eup %880 }
 0x4d8   :  { %v699_v52 = vadd.f32 %v881_v51, %v879_v49  ;;  %v883_v53 = vpop.eup %882 }
 0x4d9   :  { %v885_v54 = vpop.eup %884  ;;  %v221_v57 = vmul.f32 %v883_v53, %v871_v18 }
 0x4da   :  { %886 = vrcp.f32 %v699_v52  ;;  %v352_v62 = vmul.f32 %v885_v54, %v873_v19 }
 0x4e4   :  { %v887_v55 = vpop.eup %886 }
 0x4e5   :  { %v702_v58 = vmul.f32 %v887_v55, %v881_v51  ;;  %v704_v60 = vmul.f32 %v887_v55, %v879_v49 }
 0x4e7   :  { %v703_v61 = vadd.f32 %v702_v58, %v221_v57  ;;  %v705_v4 = vadd.f32 %v704_v60, %v352_v62 }
 0x4e9   :  { %v716_v63 = vrot.slane %v703_v61, %v715_v56  ;;  %v709_v3 = vrot.slane %v703_v61, %v708_v59  ;;  %v743_v5 = vrot.slane %v705_v4, %v708_v59  ;;  %v750_v6 = vrot.slane %v705_v4, %v715_v56 }
 0x4eb   :  { %718 = vbcast.lane.b32.xlu1 %v716_v63, 256  ;;  %711 = vbcast.lane.b32.xlu0 %v709_v3, 256 }
 0x4ef   :  { %745 = vbcast.lane.b32.xlu1 %v743_v5, 256 }
 0x4f3   :  { %752 = vbcast.lane.b32.xlu1 %v750_v6, 256 }
 0x55d   :  { %v712_v12 = vpop.permute.xlu0 %711  ;;  %v719_v13 = vpop.permute.xlu1 %718 }
 0x55e   :  { %v728_v14 = vrot.slane %v712_v12, %v727_v11  ;;  %v735_v18 = vrot.slane %v719_v13, %v727_v11 }
 0x560   :  { %v738_v17 = vmul.f32 %v728_v14, %v961_v1  ;;  %v739_v23 = vmul.f32 %v735_v18, %v979_v7 }
 0x561   :  { %v746_v15 = vpop.permute.xlu1 %745 }
 0x562   :  { %v762_v16 = vrot.slane %v746_v15, %v727_v11 }
 0x564   :  { %v772_v19 = vmul.f32 %v762_v16, %v956_v0 }
 0x565   :  { %v753_v20 = vpop.permute.xlu1 %752 }
 0x566   :  { %v774_v21 = vadd.f32 %v772_v19, %v738_v17  ;;  %v769_v22 = vrot.slane %v753_v20, %v727_v11 }
 0x568   :  { %776 = vst [vmem:[#allocation2] sm:$0xff] %v774_v21  ;;  %v773_v25 = vmul.f32 %v769_v22, %v966_v2 }
 0x56a   :  { %v775_v24 = vadd.f32 %v773_v25, %v739_v23 }
 0x56c   :  { %777 = vst [vmem:[#allocation2 + $0x8] sm:$0xff] %v775_v24 }
 0x56d   :  { %899 = shalt.err (!%p896_p4)
}
 0x56e   :  { %s900_s18 = scalar_lea.hbm %s1113_s6, 256 }
 0x56f   :  { %p901_p5 = scmp.ne.s32.totalorder %s1113_s6, %s900_s18  ;;  %p904_p6 = scmp.lt.u32.totalorder %s900_s18, %s1113_s6 }
 0x571   :  { %p906_p7 = pnand %p904_p6, %p901_p5 }
 0x573   :  { %909 = shalt.err (!%p906_p7)
}
 0x574   :  { %s916_s22 = smov 128   ;;  %s917_s23 = smov 8  }
 0x575   :  { %789 = dma.vmem_to_hbm [thread:$0]  %s784_s5, 256, %s1113_s6, [#allocation3], %s916_s22, %s916_s22, %s917_s23  }
 0x576   :  { %910 = dma.done.wait [#allocation3], 256  }
 0x577   :  { %911 = vsyncadd [#allocation3], 4294967040 }
 0x578   :  { %793 = vsyncpa [#allocation3], 1 }

</bundles_post_ra>
